<compile_context>
chip_gen: v5e
topology: v5e:2x2
jax: 0.10.0
libtpu: 0.0.40
codegen_flags: <defaults>
</compile_context>

<pallas_src>
import functools

import jax
import jax.numpy as jnp
from jax import lax
from jax.experimental import pallas as pl
from jax.experimental.pallas import tpu as pltpu


def _gelu_tanh(x):
    # tanh-approximate GELU (matches the fused fast-gelu in q8_kernels).
    c = 0.7978845608028654  # sqrt(2/pi)
    return 0.5 * x * (1.0 + jnp.tanh(c * (x + 0.044715 * x * x * x)))


def _round_up(a, b):
    return ((a + b - 1) // b) * b


def _use_int8_mxu():
    """int8 MXU datapath exists on v5e/v6e; v7-class chips are bf16/fp8 only."""
    try:
        kind = jax.devices()[0].device_kind.lower()
    except Exception:
        return True
    return "v7" not in kind and "7x" not in kind


def _epilogue(acc_i_or_f, xs, ws, b, *, fuse_gelu, has_bias, out_dtype):
    y = acc_i_or_f.astype(jnp.float32)
    y = y * xs * ws                      # dequant: per-row * per-col scales
    if has_bias:
        y = y + b
    if fuse_gelu:
        y = _gelu_tanh(y)
    return y.astype(out_dtype)


def _dot_tile(x, w, use_int8_mxu):
    if use_int8_mxu:
        # Native int8 x int8 -> int32 accumulation on the MXU (v5e / v6e).
        return lax.dot_general(
            x, w, dimension_numbers=(((1,), (0,)), ((), ())),
            preferred_element_type=jnp.int32)
    # v7x: no int8 MXU -> upconvert to bf16 (exact for int8 range), f32 acc.
    return lax.dot_general(
        x.astype(jnp.bfloat16), w.astype(jnp.bfloat16),
        dimension_numbers=(((1,), (0,)), ((), ())),
        preferred_element_type=jnp.float32)


def _q8_linear_kernel_multi_k(*refs, fuse_gelu, has_bias, use_int8_mxu):
    if has_bias:
        x_ref, w_ref, xs_ref, ws_ref, b_ref, o_ref, acc_ref = refs
    else:
        x_ref, w_ref, xs_ref, ws_ref, o_ref, acc_ref = refs
        b_ref = None

    k = pl.program_id(2)

    @pl.when(k == 0)
    def _():
        acc_ref[...] = jnp.zeros_like(acc_ref)

    acc_ref[...] += _dot_tile(x_ref[...], w_ref[...], use_int8_mxu)

    @pl.when(k == pl.num_programs(2) - 1)
    def _():
        o_ref[...] = _epilogue(
            acc_ref[...], xs_ref[...], ws_ref[...],
            b_ref[...] if has_bias else None,
            fuse_gelu=fuse_gelu, has_bias=has_bias, out_dtype=o_ref.dtype)


def _q8_linear_kernel_single_k(*refs, fuse_gelu, has_bias, use_int8_mxu):
    # K fits in a single tile: no accumulator scratch, no init/finalize gating.
    if has_bias:
        x_ref, w_ref, xs_ref, ws_ref, b_ref, o_ref = refs
    else:
        x_ref, w_ref, xs_ref, ws_ref, o_ref = refs
        b_ref = None

    acc = _dot_tile(x_ref[...], w_ref[...], use_int8_mxu)
    o_ref[...] = _epilogue(
        acc, xs_ref[...], ws_ref[...],
        b_ref[...] if has_bias else None,
        fuse_gelu=fuse_gelu, has_bias=has_bias, out_dtype=o_ref.dtype)


def _pick_tiles(M, N, K):
    # Big tiles to fill the MXU and amortize per-grid-step overhead, clamped to
    # the (padded) problem so tiny shapes don't blow up padding waste.
    tm = min(256, _round_up(M, 32))     # int8 sublane packing -> multiple of 32
    tn = min(512, _round_up(N, 128))    # lane-dense output stores
    tk = min(1024, _round_up(K, 256))
    return tm, tn, tk


def q8_linear(x_q, weight_q, bias, x_scales, w_scales,
              fuse_gelu=False, out_dtype=None, tiles=None):
    """Pallas TPU implementation of Q8F.linear.q8_linear.

    x_q:      int8  [..., K]
    weight_q: int8  [N, K]  (PyTorch nn.Linear layout)
    bias:     float32 [N] or None
    x_scales: float32 [...] (per-row scale of x)
    w_scales: float32 [N]   (per-output-channel scale of weight)
    tiles:    optional (tm, tn, tk) override (mainly for testing).
    """
    if out_dtype is None:
        out_dtype = jnp.bfloat16

    orig_shape = x_q.shape
    K = orig_shape[-1]
    N = weight_q.shape[0]
    M = 1
    for d in orig_shape[:-1]:
        M *= d

    has_bias = bias is not None
    use_int8 = _use_int8_mxu()

    if tiles is None:
        tm, tn, tk = _pick_tiles(M, N, K)
    else:
        tm, tn, tk = tiles
    M_pad = _round_up(M, tm)
    N_pad = _round_up(N, tn)
    K_pad = _round_up(K, tk)

    # 2-D operands. Weight transposed ONCE here to [K, N] (MXU-friendly RHS).
    x2 = x_q.reshape(M, K)
    w_t = jnp.transpose(weight_q, (1, 0))                       # [K, N]
    xs2 = x_scales.reshape(M, 1).astype(jnp.float32)
    ws2 = w_scales.reshape(1, N).astype(jnp.float32)

    if M_pad != M or K_pad != K:
        x2 = jnp.pad(x2, ((0, M_pad - M), (0, K_pad - K)))
    if M_pad != M:
        xs2 = jnp.pad(xs2, ((0, M_pad - M), (0, 0)))
    if K_pad != K or N_pad != N:
        w_t = jnp.pad(w_t, ((0, K_pad - K), (0, N_pad - N)))
    if N_pad != N:
        ws2 = jnp.pad(ws2, ((0, 0), (0, N_pad - N)))

    inputs = [x2, w_t, xs2, ws2]
    in_specs = [
        pl.BlockSpec((tm, tk), lambda i, j, k: (i, k)),   # x
        pl.BlockSpec((tk, tn), lambda i, j, k: (k, j)),   # weight [K, N]
        pl.BlockSpec((tm, 1), lambda i, j, k: (i, 0)),    # x_scales
        pl.BlockSpec((1, tn), lambda i, j, k: (0, j)),    # w_scales
    ]
    if has_bias:
        b2 = bias.reshape(1, N).astype(jnp.float32)
        if N_pad != N:
            b2 = jnp.pad(b2, ((0, 0), (0, N_pad - N)))
        inputs.append(b2)
        in_specs.append(pl.BlockSpec((1, tn), lambda i, j, k: (0, j)))

    k_steps = K_pad // tk
    single_k = (k_steps == 1)
    grid = (M_pad // tm, N_pad // tn, k_steps)

    acc_dtype = jnp.int32 if use_int8 else jnp.float32
    out_itemsize = jnp.dtype(out_dtype).itemsize

    # VMEM budget: double-buffered inputs + output + accumulator, with headroom.
    io_bytes = 2 * (tm * tk + tk * tn + tm * 4 + tn * 4 * (2 if has_bias else 1))
    io_bytes += 2 * tm * tn * out_itemsize
    acc_bytes = 0 if single_k else tm * tn * 4
    vmem_limit = max(2 * (io_bytes + acc_bytes) + (8 << 20), 16 << 20)
    vmem_limit = min(vmem_limit, 48 << 20)   # safe under v7x's 64 MiB physical

    if single_k:
        kernel = functools.partial(
            _q8_linear_kernel_single_k,
            fuse_gelu=fuse_gelu, has_bias=has_bias, use_int8_mxu=use_int8)
        scratch_shapes = []
    else:
        kernel = functools.partial(
            _q8_linear_kernel_multi_k,
            fuse_gelu=fuse_gelu, has_bias=has_bias, use_int8_mxu=use_int8)
        scratch_shapes = [pltpu.VMEM((tm, tn), acc_dtype)]

    out = pl.pallas_call(
        kernel,
        out_shape=jax.ShapeDtypeStruct((M_pad, N_pad), out_dtype),
        grid_spec=pltpu.PrefetchScalarGridSpec(
            num_scalar_prefetch=0,
            grid=grid,
            in_specs=in_specs,
            out_specs=pl.BlockSpec((tm, tn), lambda i, j, k: (i, j)),
            scratch_shapes=scratch_shapes,
        ),
        compiler_params=pltpu.CompilerParams(
            dimension_semantics=("parallel", "parallel", "arbitrary"),
            vmem_limit_bytes=vmem_limit),
    )(*inputs)

    if M_pad != M or N_pad != N:
        out = out[:M, :N]
    # TODO(synk): for decode-style tiny-M shapes a full-K-resident weight block
    # (grid (1, N/tn, 1)) with deeper buffering would further hide HBM latency.
    return out.reshape(*orig_shape[:-1], N)


def quantize_rowwise(x):
    """Symmetric per-row int8 quantization (glue, plain JAX)."""
    absmax = jnp.max(jnp.abs(x), axis=-1, keepdims=True)
    scale = jnp.where(absmax == 0, 1.0, absmax / 127.0)   # guard all-zero rows
    q = jnp.clip(jnp.round(x / scale), -127, 127).astype(jnp.int8)
    return q, scale[..., 0].astype(jnp.float32)


class Q8LinearJax:
    """Deterministically initialized stand-in for Q8Linear."""

    def __init__(self, in_features, out_features, bias=True, key=None):
        key = jax.random.PRNGKey(0) if key is None else key
        kw, kb = jax.random.split(key)
        # Synthetic quantized weights: pretend a fp weight was quantized row-wise.
        w_fp = jax.random.normal(kw, (out_features, in_features), jnp.float32) * 0.05
        self.weight, self.scales = quantize_rowwise(w_fp)           # int8 [N,K], f32 [N]
        self.bias = (jax.random.normal(kb, (out_features,), jnp.float32) * 0.1
                     if bias else None)
        self.in_features = in_features
        self.out_features = out_features

    def __call__(self, x, x_scales=None, fuse_gelu=False, out_dtype=None, tiles=None):
        if x.dtype != jnp.int8:
            # Non-int8 inputs are quantized row-wise first (as the CUDA op does).
            x, x_scales = quantize_rowwise(x.astype(jnp.float32))
        return q8_linear(x, self.weight, self.bias, x_scales, self.scales,
                         fuse_gelu=fuse_gelu, out_dtype=out_dtype, tiles=tiles)


if __name__ == "__main__":
    # Small shapes consistent with a linear layer: batch=2, seq=4, hidden=256 -> 128.
    batch, seq, in_features, out_features = 2, 4, 256, 128
    key = jax.random.PRNGKey(0)
    kx, kmod = jax.random.split(key)

    x = jax.random.normal(kx, (batch, seq, in_features), jnp.bfloat16)

    layer = Q8LinearJax(in_features, out_features, bias=True, key=kmod)

    # Path 1: bias + fused GELU, single-K-step specialization (default tiles).
    y = layer(x, fuse_gelu=True, out_dtype=jnp.bfloat16)
    y = jax.block_until_ready(y)

    # Reference check (plain JAX) against the same quantized operands.
    xq, xs = quantize_rowwise(x.astype(jnp.float32))
    ref = (xq.astype(jnp.float32) @ layer.weight.astype(jnp.float32).T)
    ref = ref * xs[..., None] * layer.scales[None, None, :] + layer.bias
    ref = _gelu_tanh(ref)
    assert y.shape == (batch, seq, out_features) and y.dtype == jnp.bfloat16
    assert jnp.allclose(y.astype(jnp.float32), ref, atol=2e-2, rtol=2e-2)

    # Path 2: bias-less, no-gelu, multi-K-step (forced small tk to exercise the
    # accumulator/init/finalize path on the same small shapes).
    layer_nb = Q8LinearJax(in_features, out_features, bias=False, key=kmod)
    y2 = jax.block_until_ready(layer_nb(x, tiles=(32, 128, 128)))
    ref2 = (xq.astype(jnp.float32) @ layer_nb.weight.astype(jnp.float32).T)
    ref2 = ref2 * xs[..., None] * layer_nb.scales[None, None, :]
    assert jnp.allclose(y2.astype(jnp.float32), ref2, atol=2e-2, rtol=2e-2)

    print("KERNEL_OK")
</pallas_src>

<mosaic_0001>
module attributes {stable_mosaic.version = 11 : i64} {
  func.func @_q8_linear_kernel_single_k(%arg0: i32, %arg1: i32, %arg2: i32, %arg3: memref<32x256xi8, #tpu.memory_space<vmem>>, %arg4: memref<256x128xi8, #tpu.memory_space<vmem>>, %arg5: memref<32x1xf32, #tpu.memory_space<vmem>>, %arg6: memref<1x128xf32, #tpu.memory_space<vmem>>, %arg7: memref<1x128xf32, #tpu.memory_space<vmem>>, %arg8: memref<32x128xbf16, #tpu.memory_space<vmem>>) attributes {dimension_semantics = [#tpu.dimension_semantics<parallel>, #tpu.dimension_semantics<parallel>, #tpu.dimension_semantics<arbitrary>], iteration_bounds = array<i64: 1, 1, 1>, scalar_prefetch = 0 : i64, scratch_operands = 0 : i64, tpu.core_type = #tpu.core_type<tc>, window_params = [{transform_indices = @transform_0, window_bounds = array<i64: 32, 256>}, {transform_indices = @transform_1, window_bounds = array<i64: 256, 128>}, {transform_indices = @transform_2, window_bounds = array<i64: 32, 1>}, {transform_indices = @transform_3, window_bounds = array<i64: 1, 128>}, {transform_indices = @transform_4, window_bounds = array<i64: 1, 128>}, {transform_indices = @transform_5, window_bounds = array<i64: 32, 128>}]} {
    %c0 = arith.constant 0 : index
    %c0_0 = arith.constant 0 : index
    %0 = vector.load %arg3[%c0, %c0_0] : memref<32x256xi8, #tpu.memory_space<vmem>>, vector<32x256xi8>
    %c0_1 = arith.constant 0 : index
    %c0_2 = arith.constant 0 : index
    %1 = vector.load %arg4[%c0_1, %c0_2] : memref<256x128xi8, #tpu.memory_space<vmem>>, vector<256x128xi8>
    %cst = arith.constant dense<0> : vector<32x128xi32>
    %2 = tpu.matmul %0, %1, %cst {dimension_numbers = #tpu.dot_dimension_numbers<[1], [0], [0], [1], [0, 0, 1, 1], [], []>} : vector<32x256xi8>, vector<256x128xi8>, vector<32x128xi32> -> vector<32x128xi32>
    %c0_3 = arith.constant 0 : index
    %c0_4 = arith.constant 0 : index
    %3 = vector.load %arg5[%c0_3, %c0_4] : memref<32x1xf32, #tpu.memory_space<vmem>>, vector<32x1xf32>
    %c0_5 = arith.constant 0 : index
    %c0_6 = arith.constant 0 : index
    %4 = vector.load %arg6[%c0_5, %c0_6] : memref<1x128xf32, #tpu.memory_space<vmem>>, vector<1x128xf32>
    %c0_7 = arith.constant 0 : index
    %c0_8 = arith.constant 0 : index
    %5 = vector.load %arg7[%c0_7, %c0_8] : memref<1x128xf32, #tpu.memory_space<vmem>>, vector<1x128xf32>
    %6 = arith.sitofp %2 : vector<32x128xi32> to vector<32x128xf32>
    %7 = vector.broadcast %3 : vector<32x1xf32> to vector<32x128xf32>
    %8 = arith.mulf %6, %7 : vector<32x128xf32>
    %9 = vector.broadcast %4 : vector<1x128xf32> to vector<32x128xf32>
    %10 = arith.mulf %8, %9 : vector<32x128xf32>
    %11 = vector.broadcast %5 : vector<1x128xf32> to vector<32x128xf32>
    %12 = arith.addf %10, %11 : vector<32x128xf32>
    %cst_9 = arith.constant 5.000000e-01 : f32
    %13 = vector.broadcast %cst_9 : f32 to vector<32x128xf32>
    %14 = arith.mulf %13, %12 : vector<32x128xf32>
    %cst_10 = arith.constant 4.471500e-02 : f32
    %15 = vector.broadcast %cst_10 : f32 to vector<32x128xf32>
    %16 = arith.mulf %15, %12 : vector<32x128xf32>
    %17 = arith.mulf %16, %12 : vector<32x128xf32>
    %18 = arith.mulf %17, %12 : vector<32x128xf32>
    %19 = arith.addf %12, %18 : vector<32x128xf32>
    %cst_11 = arith.constant 0.797884583 : f32
    %20 = vector.broadcast %cst_11 : f32 to vector<32x128xf32>
    %21 = arith.mulf %20, %19 : vector<32x128xf32>
    %22 = math.tanh %21 : vector<32x128xf32>
    %cst_12 = arith.constant 1.000000e+00 : f32
    %23 = vector.broadcast %cst_12 : f32 to vector<32x128xf32>
    %24 = arith.addf %23, %22 : vector<32x128xf32>
    %25 = arith.mulf %14, %24 : vector<32x128xf32>
    %26 = arith.truncf %25 : vector<32x128xf32> to vector<32x128xbf16>
    %c0_13 = arith.constant 0 : index
    %c0_14 = arith.constant 0 : index
    %27 = vector.load %arg8[%c0_13, %c0_14] : memref<32x128xbf16, #tpu.memory_space<vmem>>, vector<32x128xbf16>
    tpu.vector_store %arg8[%c0_13, %c0_14], %26 {strides = array<i32>} : memref<32x128xbf16, #tpu.memory_space<vmem>>, vector<32x128xbf16>,
    return
  }
  func.func @transform_0(%arg0: i32, %arg1: i32, %arg2: i32) -> (i32, i32) {
    %c0_i32 = arith.constant 0 : i32
    return %arg0, %arg2 : i32, i32
  }
  func.func @transform_1(%arg0: i32, %arg1: i32, %arg2: i32) -> (i32, i32) {
    %c0_i32 = arith.constant 0 : i32
    return %arg2, %arg1 : i32, i32
  }
  func.func @transform_2(%arg0: i32, %arg1: i32, %arg2: i32) -> (i32, i32) {
    %c0_i32 = arith.constant 0 : i32
    %c0_i32_0 = arith.constant 0 : i32
    return %arg0, %c0_i32 : i32, i32
  }
  func.func @transform_3(%arg0: i32, %arg1: i32, %arg2: i32) -> (i32, i32) {
    %c0_i32 = arith.constant 0 : i32
    %c0_i32_0 = arith.constant 0 : i32
    return %c0_i32, %arg1 : i32, i32
  }
  func.func @transform_4(%arg0: i32, %arg1: i32, %arg2: i32) -> (i32, i32) {
    %c0_i32 = arith.constant 0 : i32
    %c0_i32_0 = arith.constant 0 : i32
    return %c0_i32, %arg1 : i32, i32
  }
  func.func @transform_5(%arg0: i32, %arg1: i32, %arg2: i32) -> (i32, i32) {
    %c0_i32 = arith.constant 0 : i32
    return %arg0, %arg1 : i32, i32
  }
}

</mosaic_0001>

<bundles_post_ra>
// kernel: tpu_custom_call.1
= control target key start
LH: loop header
LB: loop body
LE: loop exit
PB: predicated region body
PF: predicated region fallthrough
CT: control target
= control target key end

     0   :  { %10 = vsyncpa [#allocation3], 0  ;;  %s335_s0 = inlined_call_operand.vmem [shape: s8[32,256], index: 0, kind: input, shape index: {}]   ;;  %s336_s1 = inlined_call_operand.hbm [shape: s8[256,128], index: 1, kind: input, shape index: {}]   ;;  %s337_s2 = inlined_call_operand.vmem [shape: f32[32,1], index: 2, kind: input, shape index: {}]   ;;  %s338_s3 = inlined_call_operand.vmem [shape: f32[1,128], index: 3, kind: input, shape index: {}]   ;;  %s339_s4 = inlined_call_operand.vmem [shape: f32[1,128], index: 4, kind: input, shape index: {}]   ;;  %s340_s5 = inlined_call_operand.hbm [shape: bf16[32,128], index: 5, kind: output, shape index: {}]  }
   0x1   :  { %11 = vsyncpa [#allocation4], 0  ;;  %s18_s20 = sshll.u32 %s336_s1, 4  ;;  %s268_s21 = smov [#allocation2]   ;;  %s19_s20 = int_to_ptr.hbm [resolvable:$true] %s18_s20 }
   0x2   :  { %s20_s22 = sshll.u32 %s268_s21, 4  ;;  %s269_s23 = smov 128   ;;  %s21_s22 = int_to_ptr.vmem [resolvable:$true] %s20_s22 }
   0x3   :  { %s270_s24 = smov 8  }
   0x4   :  { %26 = dma.hbm_to_vmem [thread:$0]  %s19_s20, 1024, %s21_s22, [#allocation3], %s269_s23, %s269_s23, %s270_s24  }
   0x5   :  { %264 = dma.done.wait [#allocation3], 1024  }
   0x6   :  { %265 = vsyncadd [#allocation3], 4294966272  ;;  %v271_v0 = vmov 0   ;;  %v42_v1 = vld [vmem:[#allocation2 + $0x18] sm:$0xff]  ;;  %v41_v3 = vld [vmem:[#allocation2 + $0x10] sm:$0xff]  ;;  %s173_s15 = sshll.u32 %s340_s5, 4  ;;  %s174_s15 = int_to_ptr.hbm [resolvable:$true] %s173_s15 }
   0x7   :  { %205 = vset.pattern.permute.xlu1 %v271_v0  ;;  %204 = vset.pattern.permute.xlu0 %v271_v0  ;;  %v46_v2 = vld [vmem:[#allocation2 + $0x38] sm:$0xff]  ;;  %v45_v4 = vld [vmem:[#allocation2 + $0x30] sm:$0xff]  ;;  %v75_v6 = vld [vmem:[%s337_s2] sm:$0xff]  ;;  %s273_s16 = smov 64   ;;  %s274_s17 = smov 4  }
   0x8   :  { %47 = vmatpush.s8.msra.mxu0 %v42_v1  ;;  %61 = vmatpush.s8.msra.mxu1 %v46_v2  ;;  %v77_v5 = vld [vmem:[%s337_s2 + $0x10] sm:$0xff]  ;;  %v40_v7 = vld [vmem:[#allocation2 + $0x8] sm:$0xff]  ;;  %v78_v9 = vld [vmem:[%s337_s2 + $0x18] sm:$0xff] }
   0x9   :  { %97 = vperm.xlu1 %205, %v77_v5   ;;  %87 = vperm.xlu0 %204, %v75_v6   ;;  %v44_v8 = vld [vmem:[#allocation2 + $0x28] sm:$0xff]  ;;  %v39_v11 = vld [vmem:[#allocation2] sm:$0xff] }
   0xa   :  { %v76_v10 = vld [vmem:[%s337_s2 + $0x8] sm:$0xff]  ;;  %v43_v12 = vld [vmem:[#allocation2 + $0x20] sm:$0xff] }
   0xb   :  { %v37_v13 = vld [vmem:[%s335_s0] sm:$0xff]  ;;  %v38_v14 = vld [vmem:[%s335_s0 + $0x8] sm:$0xff]  ;;  %s272_s0 = smov [#allocation5]  }
   0xc   :  { %48 = vmatpush.s8.msra.mxu0 %v41_v3  ;;  %62 = vmatpush.s8.msra.mxu1 %v45_v4  ;;  %v206_v20 = vld [vmem:[%s338_s3] ss:$0 sm:$0xff]  ;;  %s171_s3 = sshll.u32 %s272_s0, 4  ;;  %s172_s3 = int_to_ptr.vmem [resolvable:$true] %s171_s3 }
   0xd   :  { %v207_v24 = vld [vmem:[%s339_s4] ss:$0 sm:$0xff] }
  0x10   :  { %49 = vmatpush.s8.msra.mxu0 %v40_v7  ;;  %63 = vmatpush.s8.msra.mxu1 %v44_v8 }
  0x11   :  { %102 = vperm.xlu1 %205, %v78_v9   ;;  %92 = vperm.xlu0 %204, %v76_v10  }
  0x14   :  { %50 = vmatpush.s8.msra.mxu0 %v39_v11  ;;  %64 = vmatpush.s8.msra.mxu1 %v43_v12 }
  0x17   :  { %51 = vmatmul.s8.vlgmr.msra.gmra.mxu0 %v37_v13  ;;  %65 = vmatmul.s8.vlgmr.msra.gmra.mxu1 %v38_v14 }
  0x7b   :  { %v88_v15 = vpop.permute.xlu0 %87  ;;  %v98_v27 = vpop.permute.xlu1 %97 }
  0x83   :  { %v93_v26 = vpop.permute.xlu0 %92  ;;  %v103_v49 = vpop.permute.xlu1 %102 }
  0x8a   :  { %v52_v16 = vpop.s32.mrf.mxu0  ;;  %v66_v17 = vpop.s32.mrf.mxu1 }
  0x8b   :  { %v67_v18 = vadd.s32 %v66_v17, %v52_v16 }
  0x8d   :  { %v81_v19 = vcvt.s32.f32 %v67_v18 }
  0x8e   :  { %v54_v21 = vpop.s32.mrf.mxu0  ;;  %v68_v22 = vpop.s32.mrf.mxu1 }
  0x8f   :  { %v105_v23 = vmul.f32 %v88_v15, %v81_v19  ;;  %v69_v25 = vadd.s32 %v68_v22, %v54_v21 }
  0x91   :  { %v112_v28 = vmul.f32 %v206_v20, %v105_v23  ;;  %v82_v29 = vcvt.s32.f32 %v69_v25 }
  0x92   :  { %v56_v30 = vpop.s32.mrf.mxu0  ;;  %v70_v31 = vpop.s32.mrf.mxu1 }
  0x93   :  { %v119_v32 = vadd.f32 %v207_v24, %v112_v28  ;;  %v106_v33 = vmul.f32 %v93_v26, %v82_v29  ;;  %v71_v34 = vadd.s32 %v70_v31, %v56_v30 }
  0x95   :  { %v127_v35 = vmul.f32 0.044715, %v119_v32  ;;  %v113_v36 = vmul.f32 %v206_v20, %v106_v33  ;;  %v83_v37 = vcvt.s32.f32 %v71_v34  ;;  %v123_v8 = vmul.f32 0.5, %v119_v32 }
  0x96   :  { %v58_v38 = vpop.s32.mrf.mxu0  ;;  %v72_v39 = vpop.s32.mrf.mxu1 }
  0x97   :  { %v131_v40 = vmul.f32 %v127_v35, %v119_v32  ;;  %v120_v41 = vadd.f32 %v207_v24, %v113_v36  ;;  %v107_v42 = vmul.f32 %v98_v27, %v83_v37  ;;  %v73_v43 = vadd.s32 %v72_v39, %v58_v38 }
  0x99   :  { %v135_v44 = vmul.f32 %v131_v40, %v119_v32  ;;  %v128_v45 = vmul.f32 0.044715, %v120_v41  ;;  %v114_v46 = vmul.f32 %v206_v20, %v107_v42  ;;  %v84_v47 = vcvt.s32.f32 %v73_v43 }
  0x9a   :  { %v124_v7 = vmul.f32 0.5, %v120_v41 }
  0x9b   :  { %v139_v48 = vadd.f32 %v135_v44, %v119_v32  ;;  %v132_v50 = vmul.f32 %v128_v45, %v120_v41  ;;  %v121_v51 = vadd.f32 %v207_v24, %v114_v46  ;;  %v108_v52 = vmul.f32 %v103_v49, %v84_v47 }
  0x9d   :  { %v136_v53 = vmul.f32 %v132_v50, %v120_v41  ;;  %v129_v54 = vmul.f32 0.044715, %v121_v51  ;;  %v143_v55 = vmul.f32 0.7978846, %v139_v48  ;;  %v115_v56 = vmul.f32 %v206_v20, %v108_v52 }
  0x9e   :  { %v125_v17 = vmul.f32 0.5, %v121_v51 }
  0x9f   :  { %v140_v57 = vadd.f32 %v136_v53, %v120_v41  ;;  %v133_v58 = vmul.f32 %v129_v54, %v121_v51  ;;  %208 = vtanh.f32 %v143_v55  ;;  %v122_v59 = vadd.f32 %v207_v24, %v115_v56 }
  0xa1   :  { %v144_v60 = vmul.f32 0.7978846, %v140_v57  ;;  %v137_v61 = vmul.f32 %v133_v58, %v121_v51  ;;  %v130_v62 = vmul.f32 0.044715, %v122_v59  ;;  %v126_v18 = vmul.f32 0.5, %v122_v59 }
  0xa3   :  { %210 = vtanh.f32 %v144_v60  ;;  %v141_v63 = vadd.f32 %v137_v61, %v121_v51  ;;  %v134_v0 = vmul.f32 %v130_v62, %v122_v59 }
  0xa5   :  { %v209_v1 = vpop.eup %208  ;;  %v145_v2 = vmul.f32 0.7978846, %v141_v63  ;;  %v138_v3 = vmul.f32 %v134_v0, %v122_v59 }
  0xa6   :  { %v151_v5 = vadd.f32 1.0, %v209_v1 }
  0xa7   :  { %v142_v4 = vadd.f32 %v138_v3, %v122_v59  ;;  %212 = vtanh.f32 %v145_v2 }
  0xa8   :  { %v155_v11 = vmul.f32 %v151_v5, %v123_v8 }
  0xa9   :  { %v211_v6 = vpop.eup %210  ;;  %v146_v9 = vmul.f32 0.7978846, %v142_v4 }
  0xaa   :  { %v152_v10 = vadd.f32 1.0, %v211_v6 }
  0xab   :  { %214 = vtanh.f32 %v146_v9 }
  0xac   :  { %v156_v12 = vmul.f32 %v152_v10, %v124_v7 }
  0xad   :  { %v213_v13 = vpop.eup %212 }
  0xae   :  { %v189_v14 = vpack.c.bf16 %v156_v12, %v155_v11  ;;  %v153_v15 = vadd.f32 1.0, %v213_v13 }
  0xb0   :  { %190 = vst [vmem:[#allocation5] sm:$0xff] %v189_v14   ;;  %v157_v20 = vmul.f32 %v153_v15, %v125_v17 }
  0xb1   :  { %v215_v16 = vpop.eup %214 }
  0xb2   :  { %v154_v19 = vadd.f32 1.0, %v215_v16 }
  0xb4   :  { %v158_v21 = vmul.f32 %v154_v19, %v126_v18 }
  0xb6   :  { %v194_v22 = vpack.c.bf16 %v158_v21, %v157_v20 }
  0xb8   :  { %196 = vst [vmem:[#allocation5 + $0x8] sm:$0xff] %v194_v22  }
  0xb9   :  { %179 = dma.vmem_to_hbm [thread:$0]  %s172_s3, 256, %s174_s15, [#allocation4], %s273_s16, %s273_s16, %s274_s17  }
  0xba   :  { %266 = dma.done.wait [#allocation4], 256  }
  0xbb   :  { %267 = vsyncadd [#allocation4], 4294967040 }
  0xbc   :  { %184 = vsyncpa [#allocation3], 1 }
  0xbd   :  { %185 = vsyncpa [#allocation4], 1 }

</bundles_post_ra>
